<compile_context>
chip_gen: v5e
topology: v5e:2x2
jax: 0.10.0
libtpu: 0.0.40
codegen_flags: <defaults>
</compile_context>

<pallas_src>
import jax
import jax.numpy as jnp
from jax import lax
from jax.experimental import pallas as pl
from jax.experimental.pallas import tpu as pltpu


def dice_kernel(alpha_ref, x_ref, o_ref):
    # alpha_ref: SMEM scalar (shape (1,)); x_ref/o_ref: VMEM (B, tile_d)
    x = x_ref[...].astype(jnp.float32)
    b = x.shape[0]

    # Fused single-pass statistics: sum(x) and sum(x*x) computed together so
    # the two sublane reductions (XLU) and the square pass (VPU) overlap.
    s = jnp.sum(x, axis=0, keepdims=True)            # (1, tile_d)
    sq = jnp.sum(x * x, axis=0, keepdims=True)       # (1, tile_d)
    mean = s * (1.0 / b)
    # torch.std default is unbiased (Bessel correction): divide by (B - 1)
    var = (sq - b * (mean * mean)) * (1.0 / (b - 1))

    # rsqrt on the tiny stats row (EUP slot, effectively free) instead of a
    # full-tile divide on the VPU critical path.
    inv_std = lax.rsqrt(var)                          # (1, tile_d)

    p = jax.nn.sigmoid((x - mean) * inv_std + 1e-08)

    alpha = alpha_ref[0]
    # out = x*p + alpha*x*(1-p) == x * (alpha + (1-alpha)*p)
    o_ref[...] = (x * (alpha + (1.0 - alpha) * p)).astype(o_ref.dtype)


def _pick_tile_d(B, D, itemsize, target_block_bytes):
    """Largest feature-tile (multiple of 128, divisor of D) near the byte target."""
    if D % 128 != 0:
        # Full-extent block along features (bypasses the (8,128) constraint).
        return D
    td = max(128, (target_block_bytes // max(B * itemsize, 1)) // 128 * 128)
    td = min(td, D)
    while D % td != 0:
        td -= 128
    return td


def dice_pallas(x, alpha, *, target_block_bytes=4 << 20):
    B, D = x.shape
    assert B >= 2, "unbiased std (torch.std default) needs batch >= 2"
    itemsize = jnp.dtype(x.dtype).itemsize
    tile_d = _pick_tile_d(B, D, itemsize, target_block_bytes)
    grid = (D // tile_d,)

    return pl.pallas_call(
        dice_kernel,
        out_shape=jax.ShapeDtypeStruct((B, D), x.dtype),
        grid_spec=pl.GridSpec(
            grid=grid,
            in_specs=[
                pl.BlockSpec(memory_space=pltpu.MemorySpace.SMEM),   # alpha scalar
                pl.BlockSpec((B, tile_d), lambda j: (0, j)),          # x feature slice
            ],
            out_specs=pl.BlockSpec((B, tile_d), lambda j: (0, j)),
        ),
        compiler_params=pltpu.CompilerParams(
            dimension_semantics=("parallel",),
            vmem_limit_bytes=48 << 20,
        ),
    )(alpha, x)
# TODO(synk): for very large B (full batch per feature slice no longer fits
# VMEM) switch to a two-pass batch-tiled accumulator design.


def dice_ref(x, alpha):
    # Pure-JAX reference mirroring the PyTorch module exactly.
    avg = jnp.mean(x, axis=0)
    std = jnp.std(x, axis=0, ddof=1)   # torch.std default: unbiased
    norm_x = (x - avg) / std
    p = jax.nn.sigmoid(norm_x + 1e-08)
    return x * p + alpha * (x * (1.0 - p))


if __name__ == "__main__":
    key = jax.random.PRNGKey(0)
    B, D = 8, 256
    x = jax.random.normal(key, (B, D), dtype=jnp.float32)

    # nn.Parameter(torch.zeros((1,))) -> deterministic zero init
    alpha = jnp.zeros((1,), dtype=jnp.float32)

    out = dice_pallas(x, alpha)
    out = jax.block_until_ready(out)

    ref = dice_ref(x, alpha[0])
    assert out.shape == (B, D)
    assert jnp.allclose(out, ref, atol=1e-5, rtol=1e-5), (
        f"max abs err {jnp.max(jnp.abs(out - ref))}")

    print("KERNEL_OK")
</pallas_src>

<mosaic_0001>
module attributes {stable_mosaic.version = 11 : i64} {
  func.func @dice_kernel(%arg0: i32, %arg1: memref<1xf32, #tpu.memory_space<smem>>, %arg2: memref<8x256xf32, #tpu.memory_space<vmem>>, %arg3: memref<8x256xf32, #tpu.memory_space<vmem>>) attributes {dimension_semantics = [#tpu.dimension_semantics<parallel>], iteration_bounds = array<i64: 1>, scalar_prefetch = 0 : i64, scratch_operands = 0 : i64, tpu.core_type = #tpu.core_type<tc>, window_params = [{transform_indices = @transform_0, window_bounds = array<i64: 1>}, {transform_indices = @transform_1, window_bounds = array<i64: 8, 256>}, {transform_indices = @transform_2, window_bounds = array<i64: 8, 256>}]} {
    %c0 = arith.constant 0 : index
    %c0_0 = arith.constant 0 : index
    %0 = vector.load %arg2[%c0, %c0_0] : memref<8x256xf32, #tpu.memory_space<vmem>>, vector<8x256xf32>
    %cst = arith.constant dense<0.000000e+00> : vector<256xf32>
    %1 = vector.multi_reduction <add>, %0, %cst [0] : vector<8x256xf32> to vector<256xf32>
    %2 = vector.shape_cast %1 : vector<256xf32> to vector<1x256xf32>
    %3 = arith.mulf %0, %0 : vector<8x256xf32>
    %cst_1 = arith.constant dense<0.000000e+00> : vector<256xf32>
    %4 = vector.multi_reduction <add>, %3, %cst_1 [0] : vector<8x256xf32> to vector<256xf32>
    %5 = vector.shape_cast %4 : vector<256xf32> to vector<1x256xf32>
    %cst_2 = arith.constant 1.250000e-01 : f32
    %6 = vector.broadcast %cst_2 : f32 to vector<1x256xf32>
    %7 = arith.mulf %2, %6 : vector<1x256xf32>
    %8 = arith.mulf %7, %7 : vector<1x256xf32>
    %cst_3 = arith.constant 8.000000e+00 : f32
    %9 = vector.broadcast %cst_3 : f32 to vector<1x256xf32>
    %10 = arith.mulf %9, %8 : vector<1x256xf32>
    %11 = arith.subf %5, %10 : vector<1x256xf32>
    %cst_4 = arith.constant 0.142857149 : f32
    %12 = vector.broadcast %cst_4 : f32 to vector<1x256xf32>
    %13 = arith.mulf %11, %12 : vector<1x256xf32>
    %14 = math.rsqrt %13 : vector<1x256xf32>
    %15 = vector.broadcast %7 : vector<1x256xf32> to vector<8x256xf32>
    %16 = arith.subf %0, %15 : vector<8x256xf32>
    %17 = vector.broadcast %14 : vector<1x256xf32> to vector<8x256xf32>
    %18 = arith.mulf %16, %17 : vector<8x256xf32>
    %cst_5 = arith.constant 9.99999993E-9 : f32
    %19 = vector.broadcast %cst_5 : f32 to vector<8x256xf32>
    %20 = arith.addf %18, %19 : vector<8x256xf32>
    %21 = arith.negf %20 : vector<8x256xf32>
    %22 = math.exp %21 : vector<8x256xf32>
    %cst_6 = arith.constant 1.000000e+00 : f32
    %23 = vector.broadcast %cst_6 : f32 to vector<8x256xf32>
    %24 = arith.addf %23, %22 : vector<8x256xf32>
    %25 = arith.divf %23, %24 : vector<8x256xf32>
    %c0_7 = arith.constant 0 : index
    %26 = memref.load %arg1[%c0_7] : memref<1xf32, #tpu.memory_space<smem>>
    %cst_8 = arith.constant 1.000000e+00 : f32
    %27 = arith.subf %cst_8, %26 : f32
    %28 = vector.broadcast %27 : f32 to vector<8x256xf32>
    %29 = arith.mulf %28, %25 : vector<8x256xf32>
    %30 = vector.broadcast %26 : f32 to vector<8x256xf32>
    %31 = arith.addf %30, %29 : vector<8x256xf32>
    %32 = arith.mulf %0, %31 : vector<8x256xf32>
    %c0_9 = arith.constant 0 : index
    %c0_10 = arith.constant 0 : index
    %33 = vector.load %arg3[%c0_9, %c0_10] : memref<8x256xf32, #tpu.memory_space<vmem>>, vector<8x256xf32>
    tpu.vector_store %arg3[%c0_9, %c0_10], %32 {strides = array<i32>} : memref<8x256xf32, #tpu.memory_space<vmem>>, vector<8x256xf32>,
    return
  }
  func.func @transform_0(%arg0: i32) -> i32 {
    %c0_i32 = arith.constant 0 : i32
    %c0_i32_0 = arith.constant 0 : i32
    return %c0_i32 : i32
  }
  func.func @transform_1(%arg0: i32) -> (i32, i32) {
    %c0_i32 = arith.constant 0 : i32
    %c0_i32_0 = arith.constant 0 : i32
    return %c0_i32, %arg0 : i32, i32
  }
  func.func @transform_2(%arg0: i32) -> (i32, i32) {
    %c0_i32 = arith.constant 0 : i32
    %c0_i32_0 = arith.constant 0 : i32
    return %c0_i32, %arg0 : i32, i32
  }
}

</mosaic_0001>

<bundles_post_ra>
// kernel: tpu_custom_call.1
= control target key start
LH: loop header
LB: loop body
LE: loop exit
PB: predicated region body
PF: predicated region fallthrough
CT: control target
= control target key end

     0   :  { %8 = vsyncpa [#allocation4], 0  ;;  %s271_s0 = inlined_call_operand.<no memory space> [shape: f32[1], index: 0, kind: input, shape index: {}]   ;;  %s272_s1 = inlined_call_operand.hbm [shape: f32[8,256], index: 1, kind: input, shape index: {}]   ;;  %s273_s2 = inlined_call_operand.hbm [shape: f32[8,256], index: 2, kind: output, shape index: {}]  }
   0x1   :  { %9 = vsyncpa [#allocation5], 0  ;;  %s17_s11 = sshll.u32 %s272_s1, 4  ;;  %s226_s12 = smov [#allocation3]   ;;  %s18_s11 = int_to_ptr.hbm [resolvable:$true] %s17_s11 }
   0x2   :  { %s19_s13 = sshll.u32 %s226_s12, 4  ;;  %s20_s13 = int_to_ptr.vmem [resolvable:$true] %s19_s13 }
   0x3   :  { %22 = dma.hbm_to_vmem [thread:$0]  %s18_s11, 256, %s20_s13, [#allocation4]  }
   0x4   :  { %222 = dma.done.wait [#allocation4], 256  }
   0x5   :  { %223 = vsyncadd [#allocation4], 4294967040  ;;  %v246_v0 = vld [vmem:[#allocation3] sm:$0xff]  ;;  %v248_v1 = vld [vmem:[#allocation3 + $0x8] sm:$0xff]  ;;  %s130_s15 = ssub.f32 1.0, %s271_s0  ;;  %s227_s18 = smov [#allocation6]  }
   0x6   :  { %v29_v2 = vrot.slane %v246_v0, 4  ;;  %v41_v3 = vmul.f32 %v246_v0, %v246_v0  ;;  %v35_v4 = vrot.slane %v248_v1, 4  ;;  %v42_v5 = vmul.f32 %v248_v1, %v248_v1  ;;  %s146_s19 = sshll.u32 %s227_s18, 4  ;;  %s148_s22 = sshll.u32 %s273_s2, 4  ;;  %s147_s19 = int_to_ptr.vmem [resolvable:$true] %s146_s19  ;;  %s149_s22 = int_to_ptr.hbm [resolvable:$true] %s148_s22 }
   0x8   :  { %v30_v6 = vadd.f32 %v29_v2, %v246_v0  ;;  %v43_v7 = vrot.slane %v41_v3, 4  ;;  %v36_v8 = vadd.f32 %v35_v4, %v248_v1  ;;  %v49_v9 = vrot.slane %v42_v5, 4 }
   0xa   :  { %v31_v10 = vrot.slane %v30_v6, 2  ;;  %v44_v11 = vadd.f32 %v43_v7, %v41_v3  ;;  %v37_v12 = vrot.slane %v36_v8, 2  ;;  %v50_v13 = vadd.f32 %v49_v9, %v42_v5 }
   0xc   :  { %v32_v14 = vadd.f32 %v31_v10, %v30_v6  ;;  %v45_v15 = vrot.slane %v44_v11, 2  ;;  %v38_v16 = vadd.f32 %v37_v12, %v36_v8  ;;  %v51_v17 = vrot.slane %v50_v13, 2 }
   0xe   :  { %v33_v18 = vrot.slane %v32_v14, 1  ;;  %v46_v19 = vadd.f32 %v45_v15, %v44_v11  ;;  %v39_v20 = vrot.slane %v38_v16, 1  ;;  %v52_v21 = vadd.f32 %v51_v17, %v50_v13 }
   0xf   :  { %v131_v17 = vstv %s130_s15 }
  0x10   :  { %v34_v22 = vadd.f32 %v33_v18, %v32_v14  ;;  %v47_v23 = vrot.slane %v46_v19, 1  ;;  %v40_v24 = vadd.f32 %v39_v20, %v38_v16  ;;  %v53_v25 = vrot.slane %v52_v21, 1 }
  0x12   :  { %v55_v26 = vmul.f32 0.125, %v34_v22  ;;  %v56_v27 = vmul.f32 0.125, %v40_v24  ;;  %v48_v28 = vadd.f32 %v47_v23, %v46_v19  ;;  %v54_v30 = vadd.f32 %v53_v25, %v52_v21 }
  0x13   :  { %v134_v21 = vstv %s271_s0 }
  0x14   :  { %v57_v29 = vmul.f32 %v55_v26, %v55_v26  ;;  %v58_v31 = vmul.f32 %v56_v27, %v56_v27  ;;  %v85_v47 = vsub.f32 %v246_v0, %v55_v26  ;;  %v86_v50 = vsub.f32 %v248_v1, %v56_v27 }
  0x16   :  { %v59_v32 = vmul.f32 8.0, %v57_v29  ;;  %v60_v33 = vmul.f32 8.0, %v58_v31 }
  0x18   :  { %v61_v34 = vsub.f32 %v48_v28, %v59_v32  ;;  %v62_v35 = vsub.f32 %v54_v30, %v60_v33 }
  0x1a   :  { %v63_v36 = vmul.f32 0.14285715, %v61_v34  ;;  %v64_v37 = vmul.f32 0.14285715, %v62_v35 }
  0x1c   :  { %162 = vrsqrt.f32 %v63_v36  ;;  %vm71_vm0 = vweird.f32 %v63_v36  ;;  %vm81_vm2 = vweird.f32 %v64_v37 }
  0x1d   :  { %164 = vrsqrt.f32 %v64_v37 }
  0x22   :  { %v163_v38 = vpop.eup %162 }
  0x23   :  { %v165_v39 = vpop.eup %164  ;;  %v66_v40 = vmul.f32 %v163_v38, %v63_v36  ;;  %vm72_vm1 = vweird.f32 %v163_v38 }
  0x24   :  { %v76_v41 = vmul.f32 %v165_v39, %v64_v37  ;;  %vm82_vm3 = vweird.f32 %v165_v39  ;;  %vm73_vm4 = vmor %vm71_vm0, %vm72_vm1 }
  0x25   :  { %v67_v42 = vmul.f32 %v163_v38, %v66_v40  ;;  %vm83_vm5 = vmor %vm81_vm2, %vm82_vm3 }
  0x26   :  { %v77_v43 = vmul.f32 %v165_v39, %v76_v41 }
  0x27   :  { %v68_v44 = vmul.f32 0.5, %v67_v42 }
  0x28   :  { %v78_v45 = vmul.f32 0.5, %v77_v43 }
  0x29   :  { %v69_v46 = vsub.f32 1.5, %v68_v44 }
  0x2a   :  { %v79_v48 = vsub.f32 1.5, %v78_v45 }
  0x2b   :  { %v70_v49 = vmul.f32 %v163_v38, %v69_v46 }
  0x2c   :  { %v80_v51 = vmul.f32 %v165_v39, %v79_v48 }
  0x2d   :  { %v74_v52 = vsel %vm73_vm4, %v163_v38, %v70_v49 }
  0x2e   :  { %v87_v53 = vmul.f32 %v85_v47, %v74_v52  ;;  %v84_v54 = vsel %vm83_vm5, %v165_v39, %v80_v51 }
  0x2f   :  { %v88_v55 = vmul.f32 %v86_v50, %v84_v54 }
  0x30   :  { %v89_v56 = vadd.f32 1e-08, %v87_v53 }
  0x31   :  { %v90_v57 = vadd.f32 1e-08, %v88_v55 }
  0x32   :  { %v158_v58 = vmul.f32 -1.442695, %v89_v56 }
  0x33   :  { %v159_v59 = vmul.f32 -1.442695, %v90_v57 }
  0x34   :  { %166 = vpow2.f32 %v158_v58 }
  0x35   :  { %168 = vpow2.f32 %v159_v59 }
  0x3a   :  { %v167_v60 = vpop.eup %166 }
  0x3b   :  { %v169_v61 = vpop.eup %168  ;;  %v97_v62 = vadd.f32 1.0, %v167_v60 }
  0x3c   :  { %v98_v63 = vadd.f32 1.0, %v169_v61 }
  0x3d   :  { %170 = vrcp.f32 %v97_v62  ;;  %vm104_vm6 = vweird.f32 %v97_v62  ;;  %v110_v5 = vand.u32 2147483648, %v97_v62  ;;  %v108_v8 = vand.u32 2147483647, %v97_v62 }
  0x3e   :  { %172 = vrcp.f32 %v98_v63  ;;  %v125_v9 = vand.u32 2147483648, %v98_v63  ;;  %vm119_vm8 = vweird.f32 %v98_v63  ;;  %v123_v11 = vand.u32 2147483647, %v98_v63 }
  0x3f   :  { %v111_v13 = vor.u32 1.1754944e-38, %v110_v5  ;;  %vm109_vm11 = vcmp.eq.f32.partialorder %v108_v8, 8.507059e+37 }
  0x40   :  { %v126_v16 = vor.u32 1.1754944e-38, %v125_v9  ;;  %vm124_vm13 = vcmp.eq.f32.partialorder %v123_v11, 8.507059e+37 }
  0x43   :  { %v171_v2 = vpop.eup %170 }
  0x44   :  { %v173_v3 = vpop.eup %172  ;;  %v100_v4 = vmul.f32 %v171_v2, %v97_v62  ;;  %vm105_vm7 = vweird.f32 %v171_v2 }
  0x45   :  { %v115_v6 = vmul.f32 %v173_v3, %v98_v63  ;;  %vm120_vm9 = vweird.f32 %v173_v3  ;;  %vm106_vm10 = vmor %vm104_vm6, %vm105_vm7 }
  0x46   :  { %v101_v7 = vsub.f32 1.0, %v100_v4  ;;  %vm121_vm12 = vmor %vm119_vm8, %vm120_vm9 }
  0x47   :  { %v116_v10 = vsub.f32 1.0, %v115_v6 }
  0x48   :  { %v102_v12 = vmul.f32 %v171_v2, %v101_v7 }
  0x49   :  { %v117_v14 = vmul.f32 %v173_v3, %v116_v10 }
  0x4a   :  { %v103_v15 = vadd.f32 %v171_v2, %v102_v12 }
  0x4b   :  { %v118_v18 = vadd.f32 %v173_v3, %v117_v14 }
  0x4c   :  { %v107_v19 = vsel %vm106_vm10, %v171_v2, %v103_v15 }
  0x4d   :  { %v112_v20 = vsel %vm109_vm11, %v111_v13, %v107_v19  ;;  %v122_v22 = vsel %vm121_vm12, %v173_v3, %v118_v18 }
  0x4e   :  { %v132_v23 = vmul.f32 %v131_v17, %v112_v20  ;;  %v127_v24 = vsel %vm124_vm13, %v126_v16, %v122_v22 }
  0x4f   :  { %v133_v25 = vmul.f32 %v131_v17, %v127_v24 }
  0x50   :  { %v135_v26 = vadd.f32 %v134_v21, %v132_v23 }
  0x51   :  { %v136_v27 = vadd.f32 %v134_v21, %v133_v25 }
  0x52   :  { %v137_v28 = vmul.f32 %v135_v26, %v246_v0 }
  0x53   :  { %v138_v29 = vmul.f32 %v136_v27, %v248_v1 }
  0x54   :  { %139 = vst [vmem:[#allocation6] sm:$0xff] %v137_v28 }
  0x55   :  { %140 = vst [vmem:[#allocation6 + $0x8] sm:$0xff] %v138_v29 }
  0x56   :  { %151 = dma.vmem_to_hbm [thread:$0]  %s147_s19, 256, %s149_s22, [#allocation5]  }
  0x57   :  { %224 = dma.done.wait [#allocation5], 256  }
  0x58   :  { %225 = vsyncadd [#allocation5], 4294967040 }
  0x59   :  { %156 = vsyncpa [#allocation4], 1 }
  0x5a   :  { %157 = vsyncpa [#allocation5], 1 }

</bundles_post_ra>
